<compile_context>
chip_gen: v7x
topology: tpu7x:2x2x1
jax: 0.10.0
libtpu: 0.0.40
codegen_flags: <defaults>
</compile_context>

<pallas_src>
import functools

import jax
import jax.numpy as jnp
import numpy as np
from jax.experimental import pallas as pl
from jax.experimental.pallas import tpu as pltpu

GEM_P = 3.0       # GeM default p
GEM_EPS = 1e-6    # GeM clamp eps
BN_EPS = 1e-5     # nn.BatchNorm2d default eps
RMS_EPS = 1e-8    # RMSNorm eps


def _mish_fast(x):
    """mish(x) = x * tanh(softplus(x)) = x * (1 - 2 / ((1 + e^x)^2 + 1)).

    One EUP exp + one approx reciprocal instead of exp + log1p + tanh.  Clamping the exp
    argument at 40 keeps (1+e)^2 finite in f32; for x > 40 the exact value equals x to far
    below f32 precision.
    # TODO(synk): if a v7x bundle dump shows the EUP slot binding (2 pushes/elem), replace
    # the approx reciprocal with a VPU Newton-Raphson refinement, keeping only exp on EUP.
    """
    e = jnp.exp(jnp.minimum(x, 40.0))
    u = 1.0 + e
    return x * (1.0 - 2.0 * pl.reciprocal(u * u + 1.0, approx=True))


def _mish_ref(x):
    sp = jnp.where(x > 20.0, x, jnp.log1p(jnp.exp(jnp.minimum(x, 20.0))))
    return x * jnp.tanh(sp)


def _physical_vmem_bytes():
    """Physical VMEM of the local TPU generation; conservative (v7x) fallback if unknown."""
    try:
        return int(pltpu.get_tpu_info().vmem_capacity_bytes)
    except Exception:
        return 64 << 20


# --------------------------------------------------------------------------------------
# Kernel 1: mish1 + 1x1 conv (BN folded) + GeM accumulation -> pooled (N, C, 1)
# --------------------------------------------------------------------------------------
def gem_features_kernel(x_ref, w_ref, bias_ref, pooled_ref, acc_ref, *,
                        hw_total, hw_tile, mask_tail, bf16_epilogue):
    k = pl.program_id(1)                               # spatial tile (reduction axis)

    @pl.when(k == 0)
    def _():
        acc_ref[...] = jnp.zeros_like(acc_ref)

    # (C, hw_tile) tile: channels on sublanes, spatial on lanes.
    x = x_ref[...].astype(jnp.float32)                 # bf16 load -> f32 math for mish
    xm = _mish_fast(x).astype(jnp.bfloat16)            # mish1, bf16 into the MXU
    # 1x1 conv with BatchNorm(eval) folded into the weight; bias = conv_b*scale + shift.
    y = jnp.dot(w_ref[...], xm, preferred_element_type=jnp.float32)    # (C, hw_tile)
    y = y + bias_ref[...]                              # (C, 1) broadcast over lanes
    if bf16_epilogue:
        # Enable on v6e/v7x where the 4-wide VALU binds after the HBM fixes; keep f32 on
        # v5e (no bf16 VALU/EUP) and when tighter accuracy is needed.
        y = y.astype(jnp.bfloat16)
    c = jnp.maximum(y, GEM_EPS)                        # GeM clamp
    z = c * c * c                                      # explicit cube: VPU, no pow on EUP
    if mask_tail:                                      # compiled out when hw_tile | HW
        col = jax.lax.broadcasted_iota(jnp.int32, z.shape, 1)
        z = jnp.where(k * hw_tile + col < hw_total, z, 0.0)
    acc_ref[...] += jnp.sum(z.astype(jnp.float32), axis=1, keepdims=True)  # lane reduce

    @pl.when(k == pl.num_programs(1) - 1)
    def _():
        pooled = (acc_ref[...] * (1.0 / float(hw_total))) ** (1.0 / GEM_P)
        pooled_ref[...] = pooled.astype(pooled_ref.dtype)


# --------------------------------------------------------------------------------------
# Kernel 2: batched FC tail on pooled (N, C): fc1 -> mish2 -> RMSNorm -> fc2
# --------------------------------------------------------------------------------------
def fc_tail_kernel(pooled_ref, fc1w_ref, fc1b_ref, rmsw_ref,
                   fc2w_ref, fc2b_ref, out_ref):
    # TODO(synk): F.dropout (p and p/2) is treated as identity (inference semantics,
    # no stochastic mask).
    p = pooled_ref[...]                                                   # (N, C) f32
    h = jnp.dot(p.astype(jnp.bfloat16), fc1w_ref[...],
                preferred_element_type=jnp.float32) + fc1b_ref[...]       # fc1 (batched)
    h = _mish_fast(h)                                                     # mish2
    inv_rms = jax.lax.rsqrt(jnp.mean(h * h, axis=-1, keepdims=True) + RMS_EPS)
    h = h * inv_rms * rmsw_ref[...]                                       # RMSNorm
    o = jnp.dot(h.astype(jnp.bfloat16), fc2w_ref[...],
                preferred_element_type=jnp.float32) + fc2b_ref[...]       # fc2 (batched)
    out_ref[...] = o.astype(out_ref.dtype)


def cnn_head_forward(x_nchw, params, *, hw_tile=None, bf16_epilogue=False):
    N, C, H, W = x_nchw.shape
    HW = H * W
    hidden = params["fc1_b"].shape[-1]
    num_classes = params["fc2_b"].shape[-1]

    # NCHW -> (N, C, HW) is a free reshape (no relayout pass).  Cast to bf16 at the kernel
    # boundary: halves kernel-1 HBM reads + VMEM; fuses into the producing backbone op
    # under jit, and is a no-op when upstream already emits bf16 activations.
    x = x_nchw.reshape(N, C, HW)
    if x.dtype != jnp.bfloat16:
        x = x.astype(jnp.bfloat16)

    # BatchNorm(eval) folded into the 1x1 conv weight + one bias vector (host-side, free).
    conv_w2d = params["conv_w"][:, :, 0, 0].astype(jnp.float32)           # (Cout, Cin)
    bn_scale = params["bn_gamma"] / jnp.sqrt(params["bn_var"] + BN_EPS)
    bn_shift = params["bn_beta"] - params["bn_mean"] * bn_scale
    w_fused = (conv_w2d * bn_scale[:, None]).astype(jnp.bfloat16)         # (Cout, Cin) bf16
    b_fused = (params["conv_b"] * bn_scale + bn_shift).reshape(C, 1).astype(jnp.float32)

    fc1_wt = params["fc1_w"].T.astype(jnp.bfloat16)                       # (C, hidden)
    fc1_b = params["fc1_b"].reshape(1, hidden).astype(jnp.float32)
    rms_w = params["rms_w"].reshape(1, hidden).astype(jnp.float32)
    fc2_wt = params["fc2_w"].T.astype(jnp.bfloat16)                       # (hidden, classes)
    fc2_b = params["fc2_b"].reshape(1, num_classes).astype(jnp.float32)

    # ---- per-generation VMEM budget & spatial tile ------------------------------------
    phys_vmem = _physical_vmem_bytes()
    vmem_cap = int(phys_vmem * 0.72)     # leave compiler-scratch / FC-tail headroom (v7x: 64 MiB)
    w_bytes = C * C * 2                  # resident bf16 fused conv weight
    x_elt = 2                            # bf16 activations
    if hw_tile is None:
        avail = max(vmem_cap - 2 * w_bytes - (2 << 20), 2 << 20)
        per_buf = min(4 << 20, avail // 2)   # <=~4 MiB / x buffer (>=512 lanes ~ 86% of roofline)
        max_cols = max(128, (per_buf // (C * x_elt)) // 128 * 128)
        if HW <= max_cols:
            hw_tile = HW                 # whole plane in one tile (full-dim block, no mask)
        else:
            hw_tile = 0
            for cand in range(max_cols, 0, -128):   # largest 128-multiple divisor -> no tail mask
                if HW % cand == 0:
                    hw_tile = cand
                    break
            if hw_tile == 0:
                hw_tile = max_cols       # no clean divisor: mask the ragged tail in-kernel
    num_k = pl.cdiv(HW, hw_tile)
    mask_tail = (HW % hw_tile) != 0

    # Always set the scoped-VMEM limit (v5e default is only 16 MiB) and keep it well under
    # physical VMEM so compiler scratch / the FC tail still fit (critical on v7x).
    est = (2 * hw_tile * C * x_elt                   # double-buffered bf16 x window
           + 2 * w_bytes + 2 * C * 4                 # fused conv weight + bias
           + 4 * C * 4 + C * 128 * 4                 # pooled out blocks + lane-padded accumulator
           + (1 << 20))                              # slack
    vmem_limit = min(max(est + (2 << 20), 16 << 20), vmem_cap)
    # TODO(synk): if 2*C*C*2 alone exceeds vmem_cap (very large C on v7x), tile the 1x1 conv
    # over the input-channel axis as a third grid dim.

    def run_gem(single_buffer_consts):
        def inv_spec(shape):
            idx = lambda b, k: (0,) * len(shape)
            if single_buffer_consts:
                # Grid-invariant operands: single-buffer to halve resident weight VMEM.
                return pl.BlockSpec(shape, idx, pipeline_mode=pl.Buffered(1))
            return pl.BlockSpec(shape, idx)

        return pl.pallas_call(
            functools.partial(gem_features_kernel, hw_total=HW, hw_tile=hw_tile,
                              mask_tail=mask_tail, bf16_epilogue=bf16_epilogue),
            out_shape=jax.ShapeDtypeStruct((N, C, 1), jnp.float32),
            grid_spec=pltpu.PrefetchScalarGridSpec(
                num_scalar_prefetch=0,
                grid=(N, num_k),
                in_specs=[
                    pl.BlockSpec((None, C, hw_tile), lambda b, k: (b, 0, k)),  # x tile (C, hw)
                    inv_spec((C, C)),                                          # fused conv weight
                    inv_spec((C, 1)),                                          # fused bias
                ],
                out_specs=pl.BlockSpec((None, C, 1), lambda b, k: (b, 0, 0)),  # per-batch block
                scratch_shapes=[pltpu.VMEM((C, 1), jnp.float32)],
            ),
            compiler_params=pltpu.CompilerParams(
                dimension_semantics=("parallel", "arbitrary"),
                vmem_limit_bytes=vmem_limit),
        )(x, w_fused, b_fused)

    try:
        pooled = run_gem(True)
    except Exception:
        # Fallback for jax versions without pipeline_mode=pl.Buffered(1) support.
        pooled = run_gem(False)

    pooled = pooled.reshape(N, C)

    out = pl.pallas_call(
        fc_tail_kernel,
        out_shape=jax.ShapeDtypeStruct((N, num_classes), x_nchw.dtype),
        grid=(1,),
        in_specs=[
            pl.BlockSpec((N, C), lambda i: (0, 0)),
            pl.BlockSpec((C, hidden), lambda i: (0, 0)),
            pl.BlockSpec((1, hidden), lambda i: (0, 0)),
            pl.BlockSpec((1, hidden), lambda i: (0, 0)),
            pl.BlockSpec((hidden, num_classes), lambda i: (0, 0)),
            pl.BlockSpec((1, num_classes), lambda i: (0, 0)),
        ],
        out_specs=pl.BlockSpec((N, num_classes), lambda i: (0, 0)),
        compiler_params=pltpu.CompilerParams(dimension_semantics=("arbitrary",)),
    )(pooled, fc1_wt, fc1_b, rms_w, fc2_wt, fc2_b)

    return out


def cnn_head_reference(x_nchw, params):
    """Pure-JAX f32 reference (inference semantics: dropout = identity, BN running stats)."""
    hp = jax.lax.Precision.HIGHEST
    x = _mish_ref(x_nchw)
    w = params["conv_w"][:, :, 0, 0]                                      # (Cout, Cin)
    y = jnp.einsum("oc,nchw->nohw", w, x, precision=hp) \
        + params["conv_b"][None, :, None, None]
    scale = params["bn_gamma"] / jnp.sqrt(params["bn_var"] + BN_EPS)
    y = (y - params["bn_mean"][None, :, None, None]) * scale[None, :, None, None] \
        + params["bn_beta"][None, :, None, None]
    z = jnp.clip(y, GEM_EPS, None) ** GEM_P
    pooled = jnp.mean(z, axis=(2, 3)) ** (1.0 / GEM_P)                    # (N, C)
    h = jnp.dot(pooled, params["fc1_w"].T, precision=hp) + params["fc1_b"]
    h = _mish_ref(h)
    rms = jnp.sqrt(jnp.mean(h * h, axis=-1, keepdims=True) + RMS_EPS)
    h = (h / rms) * params["rms_w"]
    return jnp.dot(h, params["fc2_w"].T, precision=hp) + params["fc2_b"]


if __name__ == "__main__":
    N, C, H, W = 2, 32, 16, 16        # batch, in_features, spatial
    num_classes = 8
    hidden = C // 2

    key = jax.random.PRNGKey(0)
    keys = jax.random.split(key, 10)
    params = {
        "conv_w": jax.random.normal(keys[0], (C, C, 1, 1), jnp.float32) / jnp.sqrt(C),
        "conv_b": 0.1 * jax.random.normal(keys[1], (C,), jnp.float32),
        "bn_gamma": 1.0 + 0.1 * jax.random.normal(keys[2], (C,), jnp.float32),
        "bn_beta": 0.1 * jax.random.normal(keys[3], (C,), jnp.float32),
        "bn_mean": jnp.zeros((C,), jnp.float32),    # running stats (eval mode)
        "bn_var": jnp.ones((C,), jnp.float32),
        "fc1_w": jax.random.normal(keys[4], (hidden, C), jnp.float32) / jnp.sqrt(C),
        "fc1_b": 0.1 * jax.random.normal(keys[5], (hidden,), jnp.float32),
        "rms_w": 1.0 + 0.1 * jax.random.normal(keys[6], (hidden,), jnp.float32),
        "fc2_w": jax.random.normal(keys[7], (num_classes, hidden), jnp.float32) / jnp.sqrt(hidden),
        "fc2_b": 0.1 * jax.random.normal(keys[8], (num_classes,), jnp.float32),
    }
    x = jax.random.normal(keys[9], (N, C, H, W), jnp.float32)

    out = jax.block_until_ready(cnn_head_forward(x, params))
    ref = jax.block_until_ready(cnn_head_reference(x, params))
    # Tolerance accounts for deliberate bf16 activations/weights (f32 accumulation) + the
    # approximate EUP reciprocal inside mish.
    np.testing.assert_allclose(np.asarray(out), np.asarray(ref), rtol=2e-2, atol=3e-2)
    print("KERNEL_OK")
</pallas_src>

<mosaic_0001>
module attributes {stable_mosaic.version = 11 : i64} {
  func.func @gem_features_kernel(%arg0: i32, %arg1: i32, %arg2: memref<1x32x256xbf16, #tpu.memory_space<vmem>>, %arg3: memref<32x32xbf16, #tpu.memory_space<vmem>>, %arg4: memref<32x1xf32, #tpu.memory_space<vmem>>, %arg5: memref<1x32x1xf32, #tpu.memory_space<vmem>>, %arg6: memref<32x1xf32, #tpu.memory_space<vmem>>) attributes {dimension_semantics = [#tpu.dimension_semantics<parallel>, #tpu.dimension_semantics<arbitrary>], iteration_bounds = array<i64: 2, 1>, scalar_prefetch = 0 : i64, scratch_operands = 1 : i64, tpu.core_type = #tpu.core_type<tc>, window_params = [{transform_indices = @transform_0, window_bounds = array<i64: 1, 32, 256>}, {pipeline_mode = #tpu.pipeline_mode<synchronous>, transform_indices = @transform_1, window_bounds = array<i64: 32, 32>}, {pipeline_mode = #tpu.pipeline_mode<synchronous>, transform_indices = @transform_2, window_bounds = array<i64: 32, 1>}, {transform_indices = @transform_3, window_bounds = array<i64: 1, 32, 1>}]} {
    %c0_i32 = arith.constant 0 : i32
    %0 = arith.cmpi eq, %arg1, %c0_i32 : i32
    %1 = arith.extui %0 : i1 to i32
    %c0_i32_0 = arith.constant 0 : i32
    %2 = arith.cmpi ne, %1, %c0_i32_0 : i32
    scf.if %2 {
      %cst_20 = arith.constant 0.000000e+00 : f32
      %38 = vector.broadcast %cst_20 : f32 to vector<32x1xf32>
      %c0_21 = arith.constant 0 : index
      %c0_22 = arith.constant 0 : index
      %39 = vector.load %arg6[%c0_21, %c0_22] : memref<32x1xf32, #tpu.memory_space<vmem>>, vector<32x1xf32>
      tpu.vector_store %arg6[%c0_21, %c0_22], %38 {strides = array<i32>} : memref<32x1xf32, #tpu.memory_space<vmem>>, vector<32x1xf32>,
    } else {
    }
    %c0 = arith.constant 0 : index
    %c0_1 = arith.constant 0 : index
    %c0_2 = arith.constant 0 : index
    %3 = vector.load %arg2[%c0, %c0_1, %c0_2] : memref<1x32x256xbf16, #tpu.memory_space<vmem>>, vector<1x32x256xbf16>
    %4 = vector.shape_cast %3 : vector<1x32x256xbf16> to vector<32x256xbf16>
    %5 = arith.extf %4 : vector<32x256xbf16> to vector<32x256xf32>
    %cst = arith.constant 4.000000e+01 : f32
    %6 = vector.broadcast %cst : f32 to vector<32x256xf32>
    %7 = arith.minimumf %5, %6 : vector<32x256xf32>
    %8 = math.exp %7 : vector<32x256xf32>
    %cst_3 = arith.constant 1.000000e+00 : f32
    %9 = vector.broadcast %cst_3 : f32 to vector<32x256xf32>
    %10 = arith.addf %9, %8 : vector<32x256xf32>
    %11 = arith.mulf %10, %10 : vector<32x256xf32>
    %cst_4 = arith.constant 1.000000e+00 : f32
    %12 = vector.broadcast %cst_4 : f32 to vector<32x256xf32>
    %13 = arith.addf %11, %12 : vector<32x256xf32>
    %14 = tpu.reciprocal %13 {approx = true} : vector<32x256xf32> -> vector<32x256xf32>
    %cst_5 = arith.constant 2.000000e+00 : f32
    %15 = vector.broadcast %cst_5 : f32 to vector<32x256xf32>
    %16 = arith.mulf %15, %14 : vector<32x256xf32>
    %cst_6 = arith.constant 1.000000e+00 : f32
    %17 = vector.broadcast %cst_6 : f32 to vector<32x256xf32>
    %18 = arith.subf %17, %16 : vector<32x256xf32>
    %19 = arith.mulf %5, %18 : vector<32x256xf32>
    %20 = arith.truncf %19 : vector<32x256xf32> to vector<32x256xbf16>
    %c0_7 = arith.constant 0 : index
    %c0_8 = arith.constant 0 : index
    %21 = vector.load %arg3[%c0_7, %c0_8] : memref<32x32xbf16, #tpu.memory_space<vmem>>, vector<32x32xbf16>
    %cst_9 = arith.constant dense<0.000000e+00> : vector<32x256xf32>
    %22 = tpu.matmul %21, %20, %cst_9 {dimension_numbers = #tpu.dot_dimension_numbers<[1], [0], [0], [1], [0, 0, 1, 1], [], []>} : vector<32x32xbf16>, vector<32x256xbf16>, vector<32x256xf32> -> vector<32x256xf32>
    %c0_10 = arith.constant 0 : index
    %c0_11 = arith.constant 0 : index
    %23 = vector.load %arg4[%c0_10, %c0_11] : memref<32x1xf32, #tpu.memory_space<vmem>>, vector<32x1xf32>
    %24 = vector.broadcast %23 : vector<32x1xf32> to vector<32x256xf32>
    %25 = arith.addf %22, %24 : vector<32x256xf32>
    %cst_12 = arith.constant 9.99999997E-7 : f32
    %26 = vector.broadcast %cst_12 : f32 to vector<32x256xf32>
    %27 = arith.maximumf %25, %26 : vector<32x256xf32>
    %28 = arith.mulf %27, %27 : vector<32x256xf32>
    %29 = arith.mulf %28, %27 : vector<32x256xf32>
    %c0_13 = arith.constant 0 : index
    %c0_14 = arith.constant 0 : index
    %30 = vector.load %arg6[%c0_13, %c0_14] : memref<32x1xf32, #tpu.memory_space<vmem>>, vector<32x1xf32>
    %cst_15 = arith.constant dense<0.000000e+00> : vector<32xf32>
    %31 = vector.multi_reduction <add>, %29, %cst_15 [1] : vector<32x256xf32> to vector<32xf32>
    %32 = vector.shape_cast %31 : vector<32xf32> to vector<32x1xf32>
    %33 = arith.addf %30, %32 : vector<32x1xf32>
    %c0_16 = arith.constant 0 : index
    %c0_17 = arith.constant 0 : index
    %34 = vector.load %arg6[%c0_16, %c0_17] : memref<32x1xf32, #tpu.memory_space<vmem>>, vector<32x1xf32>
    tpu.vector_store %arg6[%c0_16, %c0_17], %33 {strides = array<i32>} : memref<32x1xf32, #tpu.memory_space<vmem>>, vector<32x1xf32>,
    %c0_i32_18 = arith.constant 0 : i32
    %35 = arith.cmpi eq, %arg1, %c0_i32_18 : i32
    %36 = arith.extui %35 : i1 to i32
    %c0_i32_19 = arith.constant 0 : i32
    %37 = arith.cmpi ne, %36, %c0_i32_19 : i32
    scf.if %37 {
      %c0_20 = arith.constant 0 : index
      %c0_21 = arith.constant 0 : index
      %38 = vector.load %arg6[%c0_20, %c0_21] : memref<32x1xf32, #tpu.memory_space<vmem>>, vector<32x1xf32>
      %cst_22 = arith.constant 3.906250e-03 : f32
      %39 = vector.broadcast %cst_22 : f32 to vector<32x1xf32>
      %40 = arith.mulf %38, %39 : vector<32x1xf32>
      %cst_23 = arith.constant 0.333333343 : f32
      %41 = vector.broadcast %cst_23 : f32 to vector<32x1xf32>
      %42 = math.powf %40, %41 : vector<32x1xf32>
      %c0_24 = arith.constant 0 : index
      %c0_25 = arith.constant 0 : index
      %c0_26 = arith.constant 0 : index
      %43 = vector.load %arg5[%c0_24, %c0_25, %c0_26] : memref<1x32x1xf32, #tpu.memory_space<vmem>>, vector<1x32x1xf32>
      %44 = vector.shape_cast %43 : vector<1x32x1xf32> to vector<32x1xf32>
      %45 = vector.shape_cast %42 : vector<32x1xf32> to vector<1x32x1xf32>
      tpu.vector_store %arg5[%c0_24, %c0_25, %c0_26], %45 {strides = array<i32>} : memref<1x32x1xf32, #tpu.memory_space<vmem>>, vector<1x32x1xf32>,
    } else {
    }
    return
  }
  func.func @transform_0(%arg0: i32, %arg1: i32) -> (i32, i32, i32) {
    %c0_i32 = arith.constant 0 : i32
    %c0_i32_0 = arith.constant 0 : i32
    return %arg0, %c0_i32, %arg1 : i32, i32, i32
  }
  func.func @transform_1(%arg0: i32, %arg1: i32) -> (i32, i32) {
    %c0_i32 = arith.constant 0 : i32
    %c0_i32_0 = arith.constant 0 : i32
    %c0_i32_1 = arith.constant 0 : i32
    return %c0_i32, %c0_i32_0 : i32, i32
  }
  func.func @transform_2(%arg0: i32, %arg1: i32) -> (i32, i32) {
    %c0_i32 = arith.constant 0 : i32
    %c0_i32_0 = arith.constant 0 : i32
    %c0_i32_1 = arith.constant 0 : i32
    return %c0_i32, %c0_i32_0 : i32, i32
  }
  func.func @transform_3(%arg0: i32, %arg1: i32) -> (i32, i32, i32) {
    %c0_i32 = arith.constant 0 : i32
    %c0_i32_0 = arith.constant 0 : i32
    %c0_i32_1 = arith.constant 0 : i32
    return %arg0, %c0_i32, %c0_i32_0 : i32, i32, i32
  }
}

module attributes {stable_mosaic.version = 11 : i64} {
  func.func @gem_features_kernel(%arg0: i32, %arg1: i32, %arg2: memref<1x32x256xbf16, #tpu.memory_space<vmem>>, %arg3: memref<32x32xbf16, #tpu.memory_space<vmem>>, %arg4: memref<32x1xf32, #tpu.memory_space<vmem>>, %arg5: memref<1x32x1xf32, #tpu.memory_space<vmem>>, %arg6: memref<32x1xf32, #tpu.memory_space<vmem>>) attributes {dimension_semantics = [#tpu.dimension_semantics<parallel>, #tpu.dimension_semantics<arbitrary>], iteration_bounds = array<i64: 2, 1>, scalar_prefetch = 0 : i64, scratch_operands = 1 : i64, tpu.core_type = #tpu.core_type<tc>, window_params = [{transform_indices = @transform_0, window_bounds = array<i64: 1, 32, 256>}, {pipeline_mode = #tpu.pipeline_mode<synchronous>, transform_indices = @transform_1, window_bounds = array<i64: 32, 32>}, {pipeline_mode = #tpu.pipeline_mode<synchronous>, transform_indices = @transform_2, window_bounds = array<i64: 32, 1>}, {transform_indices = @transform_3, window_bounds = array<i64: 1, 32, 1>}]} {
    %c0_i32 = arith.constant 0 : i32
    %0 = arith.cmpi eq, %arg1, %c0_i32 : i32
    %1 = arith.extui %0 : i1 to i32
    %c0_i32_0 = arith.constant 0 : i32
    %2 = arith.cmpi ne, %1, %c0_i32_0 : i32
    scf.if %2 {
      %cst_20 = arith.constant 0.000000e+00 : f32
      %38 = vector.broadcast %cst_20 : f32 to vector<32x1xf32>
      %c0_21 = arith.constant 0 : index
      %c0_22 = arith.constant 0 : index
      %39 = vector.load %arg6[%c0_21, %c0_22] : memref<32x1xf32, #tpu.memory_space<vmem>>, vector<32x1xf32>
      tpu.vector_store %arg6[%c0_21, %c0_22], %38 {strides = array<i32>} : memref<32x1xf32, #tpu.memory_space<vmem>>, vector<32x1xf32>,
    } else {
    }
    %c0 = arith.constant 0 : index
    %c0_1 = arith.constant 0 : index
    %c0_2 = arith.constant 0 : index
    %3 = vector.load %arg2[%c0, %c0_1, %c0_2] : memref<1x32x256xbf16, #tpu.memory_space<vmem>>, vector<1x32x256xbf16>
    %4 = vector.shape_cast %3 : vector<1x32x256xbf16> to vector<32x256xbf16>
    %5 = arith.extf %4 : vector<32x256xbf16> to vector<32x256xf32>
    %cst = arith.constant 4.000000e+01 : f32
    %6 = vector.broadcast %cst : f32 to vector<32x256xf32>
    %7 = arith.minimumf %5, %6 : vector<32x256xf32>
    %8 = math.exp %7 : vector<32x256xf32>
    %cst_3 = arith.constant 1.000000e+00 : f32
    %9 = vector.broadcast %cst_3 : f32 to vector<32x256xf32>
    %10 = arith.addf %9, %8 : vector<32x256xf32>
    %11 = arith.mulf %10, %10 : vector<32x256xf32>
    %cst_4 = arith.constant 1.000000e+00 : f32
    %12 = vector.broadcast %cst_4 : f32 to vector<32x256xf32>
    %13 = arith.addf %11, %12 : vector<32x256xf32>
    %14 = tpu.reciprocal %13 {approx = true} : vector<32x256xf32> -> vector<32x256xf32>
    %cst_5 = arith.constant 2.000000e+00 : f32
    %15 = vector.broadcast %cst_5 : f32 to vector<32x256xf32>
    %16 = arith.mulf %15, %14 : vector<32x256xf32>
    %cst_6 = arith.constant 1.000000e+00 : f32
    %17 = vector.broadcast %cst_6 : f32 to vector<32x256xf32>
    %18 = arith.subf %17, %16 : vector<32x256xf32>
    %19 = arith.mulf %5, %18 : vector<32x256xf32>
    %20 = arith.truncf %19 : vector<32x256xf32> to vector<32x256xbf16>
    %c0_7 = arith.constant 0 : index
    %c0_8 = arith.constant 0 : index
    %21 = vector.load %arg3[%c0_7, %c0_8] : memref<32x32xbf16, #tpu.memory_space<vmem>>, vector<32x32xbf16>
    %cst_9 = arith.constant dense<0.000000e+00> : vector<32x256xf32>
    %22 = tpu.matmul %21, %20, %cst_9 {dimension_numbers = #tpu.dot_dimension_numbers<[1], [0], [0], [1], [0, 0, 1, 1], [], []>} : vector<32x32xbf16>, vector<32x256xbf16>, vector<32x256xf32> -> vector<32x256xf32>
    %c0_10 = arith.constant 0 : index
    %c0_11 = arith.constant 0 : index
    %23 = vector.load %arg4[%c0_10, %c0_11] : memref<32x1xf32, #tpu.memory_space<vmem>>, vector<32x1xf32>
    %24 = vector.broadcast %23 : vector<32x1xf32> to vector<32x256xf32>
    %25 = arith.addf %22, %24 : vector<32x256xf32>
    %cst_12 = arith.constant 9.99999997E-7 : f32
    %26 = vector.broadcast %cst_12 : f32 to vector<32x256xf32>
    %27 = arith.maximumf %25, %26 : vector<32x256xf32>
    %28 = arith.mulf %27, %27 : vector<32x256xf32>
    %29 = arith.mulf %28, %27 : vector<32x256xf32>
    %c0_13 = arith.constant 0 : index
    %c0_14 = arith.constant 0 : index
    %30 = vector.load %arg6[%c0_13, %c0_14] : memref<32x1xf32, #tpu.memory_space<vmem>>, vector<32x1xf32>
    %cst_15 = arith.constant dense<0.000000e+00> : vector<32xf32>
    %31 = vector.multi_reduction <add>, %29, %cst_15 [1] : vector<32x256xf32> to vector<32xf32>
    %32 = vector.shape_cast %31 : vector<32xf32> to vector<32x1xf32>
    %33 = arith.addf %30, %32 : vector<32x1xf32>
    %c0_16 = arith.constant 0 : index
    %c0_17 = arith.constant 0 : index
    %34 = vector.load %arg6[%c0_16, %c0_17] : memref<32x1xf32, #tpu.memory_space<vmem>>, vector<32x1xf32>
    tpu.vector_store %arg6[%c0_16, %c0_17], %33 {strides = array<i32>} : memref<32x1xf32, #tpu.memory_space<vmem>>, vector<32x1xf32>,
    %c0_i32_18 = arith.constant 0 : i32
    %35 = arith.cmpi eq, %arg1, %c0_i32_18 : i32
    %36 = arith.extui %35 : i1 to i32
    %c0_i32_19 = arith.constant 0 : i32
    %37 = arith.cmpi ne, %36, %c0_i32_19 : i32
    scf.if %37 {
      %c0_20 = arith.constant 0 : index
      %c0_21 = arith.constant 0 : index
      %38 = vector.load %arg6[%c0_20, %c0_21] : memref<32x1xf32, #tpu.memory_space<vmem>>, vector<32x1xf32>
      %cst_22 = arith.constant 3.906250e-03 : f32
      %39 = vector.broadcast %cst_22 : f32 to vector<32x1xf32>
      %40 = arith.mulf %38, %39 : vector<32x1xf32>
      %cst_23 = arith.constant 0.333333343 : f32
      %41 = vector.broadcast %cst_23 : f32 to vector<32x1xf32>
      %42 = math.powf %40, %41 : vector<32x1xf32>
      %c0_24 = arith.constant 0 : index
      %c0_25 = arith.constant 0 : index
      %c0_26 = arith.constant 0 : index
      %43 = vector.load %arg5[%c0_24, %c0_25, %c0_26] : memref<1x32x1xf32, #tpu.memory_space<vmem>>, vector<1x32x1xf32>
      %44 = vector.shape_cast %43 : vector<1x32x1xf32> to vector<32x1xf32>
      %45 = vector.shape_cast %42 : vector<32x1xf32> to vector<1x32x1xf32>
      tpu.vector_store %arg5[%c0_24, %c0_25, %c0_26], %45 {strides = array<i32>} : memref<1x32x1xf32, #tpu.memory_space<vmem>>, vector<1x32x1xf32>,
    } else {
    }
    return
  }
  func.func @transform_0(%arg0: i32, %arg1: i32) -> (i32, i32, i32) {
    %c0_i32 = arith.constant 0 : i32
    %c0_i32_0 = arith.constant 0 : i32
    return %arg0, %c0_i32, %arg1 : i32, i32, i32
  }
  func.func @transform_1(%arg0: i32, %arg1: i32) -> (i32, i32) {
    %c0_i32 = arith.constant 0 : i32
    %c0_i32_0 = arith.constant 0 : i32
    %c0_i32_1 = arith.constant 0 : i32
    return %c0_i32, %c0_i32_0 : i32, i32
  }
  func.func @transform_2(%arg0: i32, %arg1: i32) -> (i32, i32) {
    %c0_i32 = arith.constant 0 : i32
    %c0_i32_0 = arith.constant 0 : i32
    %c0_i32_1 = arith.constant 0 : i32
    return %c0_i32, %c0_i32_0 : i32, i32
  }
  func.func @transform_3(%arg0: i32, %arg1: i32) -> (i32, i32, i32) {
    %c0_i32 = arith.constant 0 : i32
    %c0_i32_0 = arith.constant 0 : i32
    %c0_i32_1 = arith.constant 0 : i32
    return %arg0, %c0_i32, %c0_i32_0 : i32, i32, i32
  }
}

</mosaic_0001>

<bundles_post_ra>
// kernel: tpu_custom_call.1
= control target key start
LH: loop header
LB: loop body
LE: loop exit
PB: predicated region body
PF: predicated region fallthrough
CT: control target
= control target key end

     0   :  { %8 = vsyncpa [#allocation4], 0  ;;  %s1105_s0 = inlined_call_operand.hbm [shape: bf16[2,32,256], index: 0, kind: input, shape index: {}]   ;;  %s1106_s1 = inlined_call_operand.vmem [shape: bf16[32,32], index: 1, kind: input, shape index: {}]   ;;  %s1107_s2 = inlined_call_operand.vmem [shape: f32[32,1], index: 2, kind: input, shape index: {}]   ;;  %s1108_s3 = inlined_call_operand.vmem [shape: f32[2,32,1], index: 3, kind: output, shape index: {}]  }
   0x1   :  { %10 = vsyncpa [#allocation4 + $0x1], 0  ;;  %s871_s12 = smov 0   ;;  %s873_s13 = smov 0  }
   0x2   :  { %s875_s14 = smov 0   ;;  %s877_s15 = smov 0  }
   0x3   :  { %s879_s16 = smov 0   ;;  %s881_s17 = smov 0  }
   0x4 LB: > { %s558_s18 = sadd.s32 4294967295, %s844_s17   ;;  %s28_s19 = sadd.s32 1, %s840_s16  ;;  %s844_s17 = sphi %s881_s17, %s16_s17   ;;  %s840_s16 = sphi %s879_s16, %s1116_s16   ;;  %s836_s15 = sphi %s877_s15, %s1115_s15   ;;  %s832_s14 = sphi %s875_s14, %s1114_s14   ;;  %s828_s13 = sphi %s873_s13, %s1113_s13   ;;  %s824_s12 = sphi %s871_s12, %s1112_s12  }
   0x5   : > { %p30_p0 = scmp.ge.s32.totalorder %s28_s19, 2  ;;  %s37_s20 = sadd.s32 1, %s832_s14 }
   0x6   : > { %p44_p1 = scmp.ne.s32.totalorder %s832_s14, %s828_s13  ;;  %p45_p2 = scmp.eq.s32.totalorder %s844_s17, 0 }
   0x7   : > { %s1118_s19 = smov (%p30_p0, %s28_s19), 0  ;;  %p50_p4 = scmp.ne.s32.totalorder %s828_s13, %s824_s12 }
   0x8   : > { %p907_p3 = por %p45_p2, %p44_p1  ;;  %s32_s22 = ssub.s32 %s840_s16, %s1118_s19 }
   0x9   : > { %p51_p5 = scmp.eq.s32.totalorder %s558_s18, 0  ;;  %p35_p6 = scmp.eq.s32.totalorder %s32_s22, 0 }
   0xa   : > { %p659_p8 = scmp.lt.s32.totalorder %s844_s17, 2  ;;  %s148_s25 = sand.u32 1, %s832_s14  }
   0xb   : > { %p914_p7 = por %p51_p5, %p50_p4  ;;  %s575_s26 = sshll.u32 %s840_s16, 9 }
   0xc   : > { %s920_s24 = scalar_select %p35_p6, %s832_s14, %s37_s20  }
   0xd   : > { %s562_s27 = sshll.u32 %s148_s25, 5  ;;  %s927_s30 = scalar_lea.hbm %s1105_s0, %s575_s26 }
   0xe   : > { %s152_s4 = scalar_lea.vmem [#allocation3], %s562_s27  ;;  %p931_p9 = pnand %p659_p8, %p907_p3 }
   0xf   : > { %s161_s5 = sshll.u32 %s152_s4, 4  ;;  %s937_s7 = scalar_lea.sflag [#allocation4], %s148_s25  ;;  %s935_s5 = int_to_ptr.vmem [resolvable:$true] %s161_s5 }
  0x10   : > { %s764_s8 = scalar_lea.hbm %s927_s30, 512  ;;  %p766_p11 = pneg %p931_p9 }
  0x11   : > { %p765_p10 = scmp.ne.s32.totalorder %s927_s30, %s764_s8  ;;  %s769_s11 = scalar_lea.hbm %s1105_s0, 1024 }
  0x12   : > { %p770_p0 = scmp.lt.u32.totalorder %s927_s30, %s1105_s0  ;;  %p771_p1 = scmp.lt.u32.totalorder %s769_s11, %s764_s8 }
  0x13   : > { %p767_p12 = pnand %p766_p11, %p765_p10  ;;  %p773_p3 = scmp.lt.u32.totalorder %s764_s8, %s927_s30 }
  0x14   : > { %p772_p2 = por %p771_p1, %p770_p0 }
  0x15   : > { %p768_p13 = pneg %p767_p12 }
  0x16   : > { %p774_p4 = por %p773_p3, %p772_p2 }
  0x18   : > { %p775_p5 = pnand %p774_p4, %p768_p13 }
  0x1a   : > { %778 = shalt.err (!%p775_p5)
}
  0x1b   : > { %s779_s20 = scalar_lea.vmem %s935_s5, 512  ;;  %s846_s21 = smov [#allocation3]  }
  0x1c   : > { %p780_p6 = scmp.ne.s32.totalorder %s935_s5, %s779_s20  ;;  %s784_s22 = sshll.u32 %s846_s21, 4  ;;  %s785_s22 = int_to_ptr.vmem [resolvable:$false] %s784_s22 }
  0x1d   : > { %s786_s25 = scalar_lea.vmem %s785_s22, 1024  ;;  %p787_p12 = scmp.lt.s32.totalorder %s935_s5, %s785_s22 }
  0x1e   : > { %p782_p8 = pnand %p780_p6, %p766_p11  ;;  %p788_p0 = scmp.lt.s32.totalorder %s786_s25, %s779_s20 }
  0x20   : > { %p783_p10 = pneg %p782_p8  ;;  %p789_p1 = por %p788_p0, %p787_p12 }
  0x22   : > { %p790_p2 = pnand %p789_p1, %p783_p10 }
  0x24   : > { %793 = shalt.err (!%p790_p2)
}
  0x25   : > { %s847_s26 = smov 128   ;;  %s848_s27 = smov 8  }
  0x26   : > { %658 = dma.hbm_to_vmem [thread:$0]  (!%p931_p9), %s927_s30, 512, %s935_s5, %s937_s7, %s847_s26, %s847_s26, %s848_s27  }
  0x27   : > { %p565_p11 = scmp.ge.s32.totalorder %s844_s17, 1  ;;  %p169_p13 = scmp.lt.s32.totalorder %s844_s17, 3 }
  0x29   : > { %p170_p3 = pnand %p565_p11, %p169_p13 }
  0x2a   : > { %s175_s28 = sand.u32 (!%p170_p3), 1, %s828_s13  }
  0x2b   : > { %173 = sbr.rel (%p170_p3) target bundleno = 523 (0x20b), region = 32  ;;  %s566_s29 = sshll.u32 (!%p170_p3), %s175_s28, 5 }
  0x2c   : > { %s176_s4 = scalar_lea.sflag (!%p170_p3), [#allocation4], %s175_s28  ;;  %s179_s8 = scalar_lea.vmem (!%p170_p3), [#allocation3], %s566_s29 }
  0x32   : > { %819 = dma.done.wait (%p914_p7), %s176_s4, 512  }
  0x33   : > { %821 = vsyncadd (%p914_p7), %s176_s4, 4294966784  ;;  %v849_v0 = vmov 0   ;;  %v972_v1 = vld [vmem:[%s179_s8] sm:$0xff]  ;;  %v974_v2 = vld [vmem:[%s179_s8 + $0x8] sm:$0xff]  ;;  %vm352_vm0 = vcmask 261120   ;;  %vm213_vm1 = vcmask 7168  }
  0x34   : > { %391 = vmatprep.mubr.bf16.mxu0 %v849_v0  ;;  %401 = vmatprep.mubr.bf16.mxu1 %v849_v0  ;;  %v976_v3 = vld [vmem:[%s179_s8 + $0x10] sm:$0xff]  ;;  %v223_v4 = vunpack.c.h.bf16 %v972_v1  ;;  %v225_v5 = vunpack.c.h.bf16 %v974_v2  ;;  %v222_v6 = vunpack.c.l.bf16 %v972_v1  ;;  %v224_v7 = vunpack.c.l.bf16 %v974_v2  ;;  %v982_v8 = vld [vmem:[%s179_s8 + $0x18] sm:$0xff]  ;;  %v318_v17 = vld [vmem:[%s1107_s2] sm:$0xff]  ;;  %p203_p7 = scmp.lt.s32.totalorder %s836_s15, 1 }
  0x35   : > { %712 = vset.pattern.permute.xlu0 %v849_v0  ;;  %713 = vset.pattern.permute.xlu1 %v849_v0  ;;  %v227_v9 = vunpack.c.h.bf16 %v976_v3  ;;  %v229_v10 = vunpack.c.h.bf16 %v982_v8  ;;  %v226_v11 = vunpack.c.l.bf16 %v976_v3  ;;  %v228_v12 = vunpack.c.l.bf16 %v982_v8  ;;  %v320_v21 = vld [vmem:[%s1107_s2 + $0x10] sm:$0xff]  ;;  %v319_v22 = vld [vmem:[%s1107_s2 + $0x8] sm:$0xff]  ;;  %v321_v29 = vld [vmem:[%s1107_s2 + $0x18] sm:$0xff] }
  0x36   : > { %v231_v13 = vmin.f32 %v223_v4, 40.0  ;;  %v233_v14 = vmin.f32 %v225_v5, 40.0  ;;  %v230_v15 = vmin.f32 %v222_v6, 40.0  ;;  %v232_v16 = vmin.f32 %v224_v7, 40.0  ;;  %324 = vperm.xlu0 %712, %v318_v17   ;;  %334 = vperm.xlu1 %713, %v320_v21   ;;  %s1120_s15 = smov (!%p203_p7, %s836_s15), 1 }
  0x37   : > { %v235_v18 = vmin.f32 %v227_v9, 40.0  ;;  %v237_v19 = vmin.f32 %v229_v10, 40.0  ;;  %v234_v20 = vmin.f32 %v226_v11, 40.0  ;;  %v236_v27 = vmin.f32 %v228_v12, 40.0  ;;  %s576_s22 = sshll.u32 %s1120_s15, 5 }
  0x38   : > { %v240_v23 = vmul.f32 1.442695, %v231_v13  ;;  %v244_v24 = vmul.f32 1.442695, %v233_v14  ;;  %v238_v25 = vmul.f32 1.442695, %v230_v15  ;;  %s1063_s27 = scalar_lea.vmem %s1108_s3, %s576_s22 }
  0x39   : > { %v242_v26 = vmul.f32 1.442695, %v232_v16  ;;  %v248_v28 = vmul.f32 1.442695, %v235_v18  ;;  %v252_v30 = vmul.f32 1.442695, %v237_v19 }
  0x3a   : > { %716 = vpow2.f32 %v240_v23  ;;  %329 = vperm.xlu0 %712, %v319_v22   ;;  %v246_v31 = vmul.f32 1.442695, %v234_v20  ;;  %339 = vperm.xlu1 %713, %v321_v29   ;;  %v250_v32 = vmul.f32 1.442695, %v236_v27  ;;  %v850_v3 = vmov 0.0  }
  0x3b   : > { %718 = vpow2.f32 %v244_v24  ;;  %214 = vst.msk [vmem:[#allocation2] sm:$0xff] %vm213_vm1, %v850_v3  ;;  %215 = vst.msk [vmem:[#allocation2 + $0x8] sm:$0xff] %vm213_vm1, %v850_v3 }
  0x3c   : > { %720 = vpow2.f32 %v238_v25  ;;  %216 = vst.msk [vmem:[#allocation2 + $0x10] sm:$0xff] %vm213_vm1, %v850_v3  ;;  %217 = vst.msk [vmem:[#allocation2 + $0x18] sm:$0xff] %vm213_vm1, %v850_v3 }
  0x3d   : > { %722 = vpow2.f32 %v242_v26 }
  0x3e   : > { %724 = vpow2.f32 %v248_v28 }
  0x3f   : > { %726 = vpow2.f32 %v252_v30 }
  0x40   : > { %728 = vpow2.f32 %v246_v31 }
  0x41   : > { %730 = vpow2.f32 %v250_v32 }
  0x44   : > { %v717_v33 = vpop.eup %716 }
  0x45   : > { %v719_v34 = vpop.eup %718  ;;  %v255_v35 = vadd.f32 1.0, %v717_v33 }
  0x46   : > { %v721_v36 = vpop.eup %720  ;;  %v257_v37 = vadd.f32 1.0, %v719_v34 }
  0x47   : > { %v723_v38 = vpop.eup %722  ;;  %v263_v39 = vmul.f32 %v255_v35, %v255_v35  ;;  %v254_v40 = vadd.f32 1.0, %v721_v36 }
  0x48   : > { %v725_v41 = vpop.eup %724  ;;  %v265_v42 = vmul.f32 %v257_v37, %v257_v37  ;;  %v256_v43 = vadd.f32 1.0, %v723_v38 }
  0x49   : > { %v727_v44 = vpop.eup %726  ;;  %v271_v45 = vadd.f32 1.0, %v263_v39  ;;  %v262_v46 = vmul.f32 %v254_v40, %v254_v40  ;;  %v259_v47 = vadd.f32 1.0, %v725_v41 }
  0x4a   : > { %v729_v48 = vpop.eup %728  ;;  %v273_v49 = vadd.f32 1.0, %v265_v42  ;;  %v264_v50 = vmul.f32 %v256_v43, %v256_v43  ;;  %v261_v51 = vadd.f32 1.0, %v727_v44  ;;  %v714_v42 = vld [vmem:[%s1106_s1] sm:$0xff]  }
  0x4b   : > { %v731_v52 = vpop.eup %730  ;;  %732 = vrcp.f32 %v271_v45  ;;  %v270_v53 = vadd.f32 1.0, %v262_v46  ;;  %v267_v54 = vmul.f32 %v259_v47, %v259_v47  ;;  %v258_v55 = vadd.f32 1.0, %v729_v48 }
  0x4c   : > { %734 = vrcp.f32 %v273_v49  ;;  %v272_v56 = vadd.f32 1.0, %v264_v50  ;;  %v269_v57 = vmul.f32 %v261_v51, %v261_v51  ;;  %v260_v58 = vadd.f32 1.0, %v731_v52 }
  0x4d   : > { %736 = vrcp.f32 %v270_v53  ;;  %v275_v59 = vadd.f32 1.0, %v267_v54  ;;  %v266_v60 = vmul.f32 %v258_v55, %v258_v55 }
  0x4e   : > { %738 = vrcp.f32 %v272_v56  ;;  %v277_v61 = vadd.f32 1.0, %v269_v57  ;;  %v268_v62 = vmul.f32 %v260_v58, %v260_v58 }
  0x4f   : > { %740 = vrcp.f32 %v275_v59  ;;  %v274_v63 = vadd.f32 1.0, %v266_v60 }
  0x50   : > { %742 = vrcp.f32 %v277_v61  ;;  %v276_v0 = vadd.f32 1.0, %v268_v62 }
  0x51   : > { %744 = vrcp.f32 %v274_v63 }
  0x52   : > { %746 = vrcp.f32 %v276_v0 }
  0x55   : > { %v733_v13 = vpop.eup %732 }
  0x56   : > { %v735_v14 = vpop.eup %734  ;;  %v287_v15 = vmul.f32 2.0, %v733_v13 }
  0x57   : > { %v737_v16 = vpop.eup %736  ;;  %v289_v17 = vmul.f32 2.0, %v735_v14 }
  0x58   : > { %v739_v18 = vpop.eup %738  ;;  %v295_v19 = vsub.f32 1.0, %v287_v15  ;;  %v286_v20 = vmul.f32 2.0, %v737_v16 }
  0x59   : > { %v741_v21 = vpop.eup %740  ;;  %v297_v22 = vsub.f32 1.0, %v289_v17  ;;  %v288_v23 = vmul.f32 2.0, %v739_v18 }
  0x5a   : > { %v743_v24 = vpop.eup %742  ;;  %v303_v25 = vmul.f32 %v295_v19, %v223_v4  ;;  %v294_v26 = vsub.f32 1.0, %v286_v20  ;;  %v291_v27 = vmul.f32 2.0, %v741_v21 }
  0x5b   : > { %v745_v28 = vpop.eup %744  ;;  %v305_v29 = vmul.f32 %v297_v22, %v225_v5  ;;  %v296_v30 = vsub.f32 1.0, %v288_v23  ;;  %v293_v31 = vmul.f32 2.0, %v743_v24 }
  0x5c   : > { %v747_v32 = vpop.eup %746  ;;  %v302_v33 = vmul.f32 %v294_v26, %v222_v6  ;;  %v299_v34 = vsub.f32 1.0, %v291_v27  ;;  %v290_v35 = vmul.f32 2.0, %v745_v28 }
  0x5d   : > { %v311_v36 = vpack.c.bf16 %v305_v29, %v303_v25  ;;  %v304_v37 = vmul.f32 %v296_v30, %v224_v7  ;;  %v301_v38 = vsub.f32 1.0, %v293_v31  ;;  %v292_v4 = vmul.f32 2.0, %v747_v32 }
  0x5e   : > { %v307_v39 = vmul.f32 %v299_v34, %v227_v9  ;;  %v298_v40 = vsub.f32 1.0, %v290_v35 }
  0x5f   : > { %359 = vmatprep.subr.bf16.mxu0 %v311_v36  ;;  %577 = vmatprep.subr.bf16.mxu1 %v311_v36  ;;  %v310_v5 = vpack.c.bf16 %v304_v37, %v302_v33  ;;  %v309_v41 = vmul.f32 %v301_v38, %v229_v10  ;;  %v300_v1 = vsub.f32 1.0, %v292_v4  ;;  %v715_v10 = vld [vmem:[%s1106_s1 + $0x8] sm:$0xff]   ;;  %v436_v36 = vld [vmem:[#allocation2] sm:$0xff] }
  0x60   : > { %v306_v6 = vmul.f32 %v298_v40, %v226_v11  ;;  %v437_v38 = vld [vmem:[#allocation2 + $0x8] sm:$0xff]  ;;  %v438_v40 = vld [vmem:[#allocation2 + $0x10] sm:$0xff] }
  0x61   : > { %360 = vmatpush1.bf16.msra.mxu0 %v310_v5  ;;  %579 = vmatpush1.bf16.msra.mxu1 %v310_v5  ;;  %v313_v2 = vpack.c.bf16 %v309_v41, %v307_v39  ;;  %v308_v7 = vmul.f32 %v300_v1, %v228_v12 }
  0x63   : > { %361 = vmatprep.subr.bf16.mxu0 %v313_v2  ;;  %578 = vmatprep.subr.bf16.mxu1 %v313_v2  ;;  %v312_v9 = vpack.c.bf16 %v308_v7, %v306_v6  ;;  %v439_v6 = vld [vmem:[#allocation2 + $0x18] sm:$0xff] }
  0x65   : > { %362 = vmatpush1.bf16.msra.mxu0 %v312_v9  ;;  %580 = vmatpush1.bf16.msra.mxu1 %v312_v9 }
  0x68   : > { %571 = vmatmul.mubr.msk.bf16.vlgmr.msra.gmra.mrb[0].mxu0 %vm352_vm0, %v714_v42  ;;  %572 = vmatmul.mubr.msk.bf16.vlgmr.msra.gmra.mrb[0].mxu1 %vm352_vm0, %v715_v10 }
  0xb5   : > { %v325_v8 = vpop.permute.xlu0 %324  ;;  %v335_v11 = vpop.permute.xlu1 %334 }
  0xb9   : > { %v330_v12 = vpop.permute.xlu0 %329  ;;  %v340_v43 = vpop.permute.xlu1 %339 }
 0x13b   : > { %v393_v44 = vpop.f32.mrb[0].mxu0  ;;  %v403_v45 = vpop.f32.mrb[0].mxu1 }
 0x13c   : > { %v394_v46 = vadd.f32 %v393_v44, %v325_v8  ;;  %v404_v47 = vadd.f32 %v403_v45, %v335_v11  ;;  %v395_v48 = vpop.f32.mrb[1].mxu0  ;;  %v405_v49 = vpop.f32.mrb[1].mxu1 }
 0x13d   : > { %v396_v50 = vadd.f32 %v395_v48, %v325_v8  ;;  %v406_v51 = vadd.f32 %v405_v49, %v335_v11  ;;  %v397_v52 = vpop.f32.mrb[2].mxu0  ;;  %v407_v53 = vpop.f32.mrb[2].mxu1 }
 0x13e   : > { %v412_v54 = vmax.f32 %v394_v46, 1e-06  ;;  %v416_v55 = vmax.f32 %v404_v47, 1e-06  ;;  %v398_v56 = vadd.f32 %v397_v52, %v330_v12  ;;  %v408_v57 = vadd.f32 %v407_v53, %v340_v43  ;;  %v399_v58 = vpop.f32.mrb[3].mxu0  ;;  %v409_v59 = vpop.f32.mrb[3].mxu1 }
 0x13f   : > { %v413_v60 = vmax.f32 %v396_v50, 1e-06  ;;  %v417_v61 = vmax.f32 %v406_v51, 1e-06  ;;  %v400_v62 = vadd.f32 %v399_v58, %v330_v12  ;;  %v410_v63 = vadd.f32 %v409_v59, %v340_v43 }
 0x140   : > { %v420_v0 = vmul.f32 %v412_v54, %v412_v54  ;;  %v424_v13 = vmul.f32 %v416_v55, %v416_v55  ;;  %v414_v14 = vmax.f32 %v398_v56, 1e-06  ;;  %v418_v15 = vmax.f32 %v408_v57, 1e-06 }
 0x141   : > { %v421_v16 = vmul.f32 %v413_v60, %v413_v60  ;;  %v425_v17 = vmul.f32 %v417_v61, %v417_v61  ;;  %v415_v18 = vmax.f32 %v400_v62, 1e-06  ;;  %v419_v19 = vmax.f32 %v410_v63, 1e-06 }
 0x142   : > { %v428_v20 = vmul.f32 %v420_v0, %v412_v54  ;;  %v432_v21 = vmul.f32 %v424_v13, %v416_v55  ;;  %v422_v22 = vmul.f32 %v414_v14, %v414_v14  ;;  %v426_v23 = vmul.f32 %v418_v15, %v418_v15 }
 0x143   : > { %v429_v24 = vmul.f32 %v421_v16, %v413_v60  ;;  %v433_v25 = vmul.f32 %v425_v17, %v417_v61  ;;  %v423_v26 = vmul.f32 %v415_v18, %v415_v18  ;;  %v427_v27 = vmul.f32 %v419_v19, %v419_v19 }
 0x144   : > { %v430_v28 = vmul.f32 %v422_v22, %v414_v14  ;;  %v434_v29 = vmul.f32 %v426_v23, %v418_v15 }
 0x145   : > { %v431_v30 = vmul.f32 %v423_v26, %v415_v18  ;;  %v435_v31 = vmul.f32 %v427_v27, %v419_v19  ;;  %v440_v32 = vadd.f32 %v429_v24, %v428_v20  ;;  %v446_v33 = vadd.f32 %v433_v25, %v432_v21 }
 0x147   : > { %441 = vadd.xlane.f32.xlu0 %v440_v32  ;;  %v443_v34 = vadd.f32 %v431_v30, %v430_v28  ;;  %v449_v35 = vadd.f32 %v435_v31, %v434_v29 }
 0x149   : > { %444 = vadd.xlane.f32.xlu1 %v443_v34 }
 0x14b   : > { %447 = vadd.xlane.f32.xlu0 %v446_v33 }
 0x14f   : > { %450 = vadd.xlane.f32.xlu0 %v449_v35 }
 0x1d4   : > { %v442_v37 = vpop.xlane.xlu0 %441 }
 0x1d5   : > { %v452_v4 = vadd.f32 %v442_v37, %v436_v36 }
 0x1d6   : > { %v445_v39 = vpop.xlane.xlu1 %444 }
 0x1d7   : > { %457 = vst.msk [vmem:[#allocation2] sm:$0xff] %vm213_vm1, %v452_v4  ;;  %v453_v5 = vadd.f32 %v445_v39, %v437_v38 }
 0x1d8   : > { %v448_v41 = vpop.xlane.xlu0 %447 }
 0x1d9   : > { %458 = vst.msk [vmem:[#allocation2 + $0x8] sm:$0xff] %vm213_vm1, %v453_v5  ;;  %v454_v1 = vadd.f32 %v448_v41, %v438_v40 }
 0x1db   : > { %459 = vst.msk [vmem:[#allocation2 + $0x10] sm:$0xff] %vm213_vm1, %v454_v1 }
 0x1dc   : > { %v451_v2 = vpop.xlane.xlu0 %450 }
 0x1dd   : > { %v455_v7 = vadd.f32 %v451_v2, %v439_v6 }
 0x1de   : > { %v464_v9 = vld [vmem:[#allocation2] sm:$0xff] }
 0x1df   : > { %v468_v42 = vmul.f32 0.00390625, %v464_v9  ;;  %460 = vst.msk [vmem:[#allocation2 + $0x18] sm:$0xff] %vm213_vm1, %v455_v7 }
 0x1e0   : > { %v465_v10 = vld [vmem:[#allocation2 + $0x8] sm:$0xff] }
 0x1e1   : > { %v583_v3 = vand.u32 2147483647, %v468_v42  ;;  %v469_v8 = vmul.f32 0.00390625, %v465_v10  ;;  %v587_v56 = vand.u32 2147483648, %v468_v42  ;;  %vm582_vm4 = vcmp.lt.f32.partialorder %v468_v42, 0.0 }
 0x1e2   : > { %v466_v11 = vld [vmem:[#allocation2 + $0x10] sm:$0xff]  ;;  %vm581_vm5 = vcmp.eq.f32.partialorder %v468_v42, 0.0 }
 0x1e3   : > { %748 = vlog2.f32 %v583_v3  ;;  %v601_v12 = vand.u32 2147483647, %v469_v8  ;;  %v1046_v43 = vmul.f32 0.00390625, %v466_v11  ;;  %vm591_vm2 = vweird.f32 %v583_v3 }
 0x1e4   : > { %v605_v59 = vand.u32 2147483648, %v469_v8  ;;  %vm593_vm3 = vcmp.eq.f32.partialorder %v583_v3, 0.0  ;;  %vm584_vm7 = vcmp.eq.f32.partialorder %v583_v3, inf  ;;  %vm600_vm9 = vcmp.lt.f32.partialorder %v469_v8, 0.0 }
 0x1e5   : > { %750 = vlog2.f32 %v601_v12  ;;  %v1049_v45 = vand.u32 2147483647, %v1046_v43  ;;  %vm609_vm6 = vweird.f32 %v601_v12  ;;  %v623_v13 = vand.u32 2147483648, %v1046_v43 }
 0x1e6   : > { %v467_v44 = vld [vmem:[#allocation2 + $0x18] sm:$0xff]  ;;  %vm611_vm8 = vcmp.eq.f32.partialorder %v601_v12, 0.0  ;;  %vm599_vm10 = vcmp.eq.f32.partialorder %v469_v8, 0.0  ;;  %vm602_vm12 = vcmp.eq.f32.partialorder %v601_v12, inf  ;;  %vm618_vm14 = vcmp.lt.f32.partialorder %v1046_v43, 0.0 }
 0x1e7   : > { %v1051_v46 = vmul.f32 0.00390625, %v467_v44  ;;  %752 = vlog2.f32 %v1049_v45  ;;  %vm627_vm11 = vweird.f32 %v1049_v45  ;;  %vm629_vm13 = vcmp.eq.f32.partialorder %v1049_v45, 0.0 }
 0x1e8   : > { %vm617_vm15 = vcmp.eq.f32.partialorder %v1046_v43, 0.0 }
 0x1e9   : > { %v1055_v47 = vand.u32 2147483647, %v1051_v46  ;;  %v641_v21 = vand.u32 2147483648, %v1051_v46 }
 0x1eb   : > { %754 = vlog2.f32 %v1055_v47  ;;  %vm645_vm0 = vweird.f32 %v1055_v47 }
 0x1ed   : > { %v749_v48 = vpop.eup %748 }
 0x1ee   : > { %v588_v49 = vmul.f32 0.33333334, %v749_v48 }
 0x1ef   : > { %v751_v50 = vpop.eup %750 }
 0x1f0   : > { %756 = vpow2.f32 %v588_v49  ;;  %v606_v51 = vmul.f32 0.33333334, %v751_v50 }
 0x1f1   : > { %v753_v52 = vpop.eup %752 }
 0x1f2   : > { %758 = vpow2.f32 %v606_v51  ;;  %v624_v53 = vmul.f32 0.33333334, %v753_v52 }
 0x1f4   : > { %760 = vpow2.f32 %v624_v53 }
 0x1f5   : > { %v755_v54 = vpop.eup %754 }
 0x1f6   : > { %v642_v55 = vmul.f32 0.33333334, %v755_v54 }
 0x1f8   : > { %762 = vpow2.f32 %v642_v55 }
 0x1fa   : > { %v757_v57 = vpop.eup %756 }
 0x1fb   : > { %v590_v58 = vor.u32 %v757_v57, %v587_v56 }
 0x1fc   : > { %v759_v60 = vpop.eup %758 }
 0x1fd   : > { %v592_v61 = vsel %vm591_vm2, %v468_v42, %v590_v58  ;;  %v608_v63 = vor.u32 %v759_v60, %v605_v59  ;;  %vm620_vm2 = vcmp.eq.f32.partialorder %v1049_v45, inf }
 0x1fe   : > { %v595_v62 = vsel %vm593_vm3, %v587_v56, %v592_v61  ;;  %v761_v14 = vpop.eup %760  ;;  %vm647_vm3 = vcmp.eq.f32.partialorder %v1055_v47, 0.0 }
 0x1ff   : > { %v596_v0 = vsel %vm582_vm4, nan, %v595_v62  ;;  %v610_v16 = vsel %vm609_vm6, %v469_v8, %v608_v63  ;;  %v626_v19 = vor.u32 %v761_v14, %v623_v13  ;;  %vm636_vm4 = vcmp.lt.f32.partialorder %v1051_v46, 0.0 }
 0x200   : > { %v597_v15 = vsel %vm581_vm5, 0.0, %v596_v0  ;;  %v613_v18 = vsel %vm611_vm8, %v605_v59, %v610_v16  ;;  %vm635_vm5 = vcmp.eq.f32.partialorder %v1051_v46, 0.0  ;;  %vm638_vm6 = vcmp.eq.f32.partialorder %v1055_v47, inf }
 0x201   : > { %v598_v17 = vsel %vm584_vm7, inf, %v597_v15  ;;  %v614_v20 = vsel %vm600_vm9, nan, %v613_v18  ;;  %v628_v24 = vsel %vm627_vm11, %v1046_v43, %v626_v19 }
 0x202   : > { %476 = vst.msk [vmem:[%s1063_s27] sm:$0xff] %vm213_vm1, %v598_v17  ;;  %v763_v22 = vpop.eup %762  ;;  %v615_v23 = vsel %vm599_vm10, 0.0, %v614_v20  ;;  %v631_v26 = vsel %vm629_vm13, %v623_v13, %v628_v24 }
 0x203   : > { %v616_v25 = vsel %vm602_vm12, inf, %v615_v23  ;;  %v644_v27 = vor.u32 %v763_v22, %v641_v21  ;;  %v632_v28 = vsel %vm618_vm14, nan, %v631_v26 }
 0x204   : > { %477 = vst.msk [vmem:[%s1063_s27 + $0x8] sm:$0xff] %vm213_vm1, %v616_v25  ;;  %v633_v29 = vsel %vm617_vm15, 0.0, %v632_v28 }
 0x205   : > { %v646_v30 = vsel %vm645_vm0, %v1051_v46, %v644_v27  ;;  %v634_v31 = vsel %vm620_vm2, inf, %v633_v29 }
 0x206   : > { %v649_v32 = vsel %vm647_vm3, %v641_v21, %v646_v30  ;;  %478 = vst.msk [vmem:[%s1063_s27 + $0x10] sm:$0xff] %vm213_vm1, %v634_v31 }
 0x207   : > { %v650_v33 = vsel %vm636_vm4, nan, %v649_v32 }
 0x208   : > { %v651_v34 = vsel %vm635_vm5, 0.0, %v650_v33 }
 0x209   : > { %v652_v35 = vsel %vm638_vm6, inf, %v651_v34 }
 0x20a   : > { %479 = vst.msk [vmem:[%s1063_s27 + $0x18] sm:$0xff] %vm213_vm1, %v652_v35 }
 0x20b PF: > { %s16_s17 = sadd.s32 1, %s844_s17   ;;  %s1112_s12 = smov %s828_s13 }
 0x20c   : > { %p13_p9 = scmp.ge.s32.totalorder %s16_s17, 4   ;;  %s1113_s13 = smov %s832_s14 }
 0x20d   : > { %s1114_s14 = smov %s920_s24  ;;  %s1115_s15 = smov %s840_s16 }
 0x20e   : > { %s1116_s16 = smov %s1118_s19  ;;  %15 = sbr.rel (!%p13_p9) target bundleno = 4 (0x4), region = 80 }
 0x215   :  { %501 = vsyncpa [#allocation4], 1 }
 0x216   :  { %503 = vsyncpa [#allocation4 + $0x1], 1 }

// kernel: tpu_custom_call.1
= control target key start
LH: loop header
LB: loop body
LE: loop exit
PB: predicated region body
PF: predicated region fallthrough
CT: control target
= control target key end

     0   :  { %8 = vsyncpa [#allocation4], 0  ;;  %s1105_s0 = inlined_call_operand.hbm [shape: bf16[2,32,256], index: 0, kind: input, shape index: {}]   ;;  %s1106_s1 = inlined_call_operand.vmem [shape: bf16[32,32], index: 1, kind: input, shape index: {}]   ;;  %s1107_s2 = inlined_call_operand.vmem [shape: f32[32,1], index: 2, kind: input, shape index: {}]   ;;  %s1108_s3 = inlined_call_operand.vmem [shape: f32[2,32,1], index: 3, kind: output, shape index: {}]  }
   0x1   :  { %10 = vsyncpa [#allocation4 + $0x1], 0  ;;  %s871_s12 = smov 0   ;;  %s873_s13 = smov 0  }
   0x2   :  { %s875_s14 = smov 0   ;;  %s877_s15 = smov 0  }
   0x3   :  { %s879_s16 = smov 0   ;;  %s881_s17 = smov 0  }
   0x4 LB: > { %s558_s18 = sadd.s32 4294967295, %s844_s17   ;;  %s28_s19 = sadd.s32 1, %s840_s16  ;;  %s844_s17 = sphi %s881_s17, %s16_s17   ;;  %s840_s16 = sphi %s879_s16, %s1116_s16   ;;  %s836_s15 = sphi %s877_s15, %s1115_s15   ;;  %s832_s14 = sphi %s875_s14, %s1114_s14   ;;  %s828_s13 = sphi %s873_s13, %s1113_s13   ;;  %s824_s12 = sphi %s871_s12, %s1112_s12  }
   0x5   : > { %p30_p0 = scmp.ge.s32.totalorder %s28_s19, 2  ;;  %s37_s20 = sadd.s32 1, %s832_s14 }
   0x6   : > { %p44_p1 = scmp.ne.s32.totalorder %s832_s14, %s828_s13  ;;  %p45_p2 = scmp.eq.s32.totalorder %s844_s17, 0 }
   0x7   : > { %s1118_s19 = smov (%p30_p0, %s28_s19), 0  ;;  %p50_p4 = scmp.ne.s32.totalorder %s828_s13, %s824_s12 }
   0x8   : > { %p907_p3 = por %p45_p2, %p44_p1  ;;  %s32_s22 = ssub.s32 %s840_s16, %s1118_s19 }
   0x9   : > { %p51_p5 = scmp.eq.s32.totalorder %s558_s18, 0  ;;  %p35_p6 = scmp.eq.s32.totalorder %s32_s22, 0 }
   0xa   : > { %p659_p8 = scmp.lt.s32.totalorder %s844_s17, 2  ;;  %s148_s25 = sand.u32 1, %s832_s14  }
   0xb   : > { %p914_p7 = por %p51_p5, %p50_p4  ;;  %s575_s26 = sshll.u32 %s840_s16, 9 }
   0xc   : > { %s920_s24 = scalar_select %p35_p6, %s832_s14, %s37_s20  }
   0xd   : > { %s562_s27 = sshll.u32 %s148_s25, 5  ;;  %s927_s30 = scalar_lea.hbm %s1105_s0, %s575_s26 }
   0xe   : > { %s152_s4 = scalar_lea.vmem [#allocation3], %s562_s27  ;;  %p931_p9 = pnand %p659_p8, %p907_p3 }
   0xf   : > { %s161_s5 = sshll.u32 %s152_s4, 4  ;;  %s937_s7 = scalar_lea.sflag [#allocation4], %s148_s25  ;;  %s935_s5 = int_to_ptr.vmem [resolvable:$true] %s161_s5 }
  0x10   : > { %s764_s8 = scalar_lea.hbm %s927_s30, 512  ;;  %p766_p11 = pneg %p931_p9 }
  0x11   : > { %p765_p10 = scmp.ne.s32.totalorder %s927_s30, %s764_s8  ;;  %s769_s11 = scalar_lea.hbm %s1105_s0, 1024 }
  0x12   : > { %p770_p0 = scmp.lt.u32.totalorder %s927_s30, %s1105_s0  ;;  %p771_p1 = scmp.lt.u32.totalorder %s769_s11, %s764_s8 }
  0x13   : > { %p767_p12 = pnand %p766_p11, %p765_p10  ;;  %p773_p3 = scmp.lt.u32.totalorder %s764_s8, %s927_s30 }
  0x14   : > { %p772_p2 = por %p771_p1, %p770_p0 }
  0x15   : > { %p768_p13 = pneg %p767_p12 }
  0x16   : > { %p774_p4 = por %p773_p3, %p772_p2 }
  0x18   : > { %p775_p5 = pnand %p774_p4, %p768_p13 }
  0x1a   : > { %778 = shalt.err (!%p775_p5)
}
  0x1b   : > { %s779_s20 = scalar_lea.vmem %s935_s5, 512  ;;  %s846_s21 = smov [#allocation3]  }
  0x1c   : > { %p780_p6 = scmp.ne.s32.totalorder %s935_s5, %s779_s20  ;;  %s784_s22 = sshll.u32 %s846_s21, 4  ;;  %s785_s22 = int_to_ptr.vmem [resolvable:$false] %s784_s22 }
  0x1d   : > { %s786_s25 = scalar_lea.vmem %s785_s22, 1024  ;;  %p787_p12 = scmp.lt.s32.totalorder %s935_s5, %s785_s22 }
  0x1e   : > { %p782_p8 = pnand %p780_p6, %p766_p11  ;;  %p788_p0 = scmp.lt.s32.totalorder %s786_s25, %s779_s20 }
  0x20   : > { %p783_p10 = pneg %p782_p8  ;;  %p789_p1 = por %p788_p0, %p787_p12 }
  0x22   : > { %p790_p2 = pnand %p789_p1, %p783_p10 }
  0x24   : > { %793 = shalt.err (!%p790_p2)
}
  0x25   : > { %s847_s26 = smov 128   ;;  %s848_s27 = smov 8  }
  0x26   : > { %658 = dma.hbm_to_vmem [thread:$0]  (!%p931_p9), %s927_s30, 512, %s935_s5, %s937_s7, %s847_s26, %s847_s26, %s848_s27  }
  0x27   : > { %p565_p11 = scmp.ge.s32.totalorder %s844_s17, 1  ;;  %p169_p13 = scmp.lt.s32.totalorder %s844_s17, 3 }
  0x29   : > { %p170_p3 = pnand %p565_p11, %p169_p13 }
  0x2a   : > { %s175_s28 = sand.u32 (!%p170_p3), 1, %s828_s13  }
  0x2b   : > { %173 = sbr.rel (%p170_p3) target bundleno = 523 (0x20b), region = 32  ;;  %s566_s29 = sshll.u32 (!%p170_p3), %s175_s28, 5 }
  0x2c   : > { %s176_s4 = scalar_lea.sflag (!%p170_p3), [#allocation4], %s175_s28  ;;  %s179_s8 = scalar_lea.vmem (!%p170_p3), [#allocation3], %s566_s29 }
  0x32   : > { %819 = dma.done.wait (%p914_p7), %s176_s4, 512  }
  0x33   : > { %821 = vsyncadd (%p914_p7), %s176_s4, 4294966784  ;;  %v849_v0 = vmov 0   ;;  %v972_v1 = vld [vmem:[%s179_s8] sm:$0xff]  ;;  %v974_v2 = vld [vmem:[%s179_s8 + $0x8] sm:$0xff]  ;;  %vm352_vm0 = vcmask 261120   ;;  %vm213_vm1 = vcmask 7168  }
  0x34   : > { %391 = vmatprep.mubr.bf16.mxu0 %v849_v0  ;;  %401 = vmatprep.mubr.bf16.mxu1 %v849_v0  ;;  %v976_v3 = vld [vmem:[%s179_s8 + $0x10] sm:$0xff]  ;;  %v223_v4 = vunpack.c.h.bf16 %v972_v1  ;;  %v225_v5 = vunpack.c.h.bf16 %v974_v2  ;;  %v222_v6 = vunpack.c.l.bf16 %v972_v1  ;;  %v224_v7 = vunpack.c.l.bf16 %v974_v2  ;;  %v982_v8 = vld [vmem:[%s179_s8 + $0x18] sm:$0xff]  ;;  %v318_v17 = vld [vmem:[%s1107_s2] sm:$0xff]  ;;  %p203_p7 = scmp.lt.s32.totalorder %s836_s15, 1 }
  0x35   : > { %712 = vset.pattern.permute.xlu0 %v849_v0  ;;  %713 = vset.pattern.permute.xlu1 %v849_v0  ;;  %v227_v9 = vunpack.c.h.bf16 %v976_v3  ;;  %v229_v10 = vunpack.c.h.bf16 %v982_v8  ;;  %v226_v11 = vunpack.c.l.bf16 %v976_v3  ;;  %v228_v12 = vunpack.c.l.bf16 %v982_v8  ;;  %v320_v21 = vld [vmem:[%s1107_s2 + $0x10] sm:$0xff]  ;;  %v319_v22 = vld [vmem:[%s1107_s2 + $0x8] sm:$0xff]  ;;  %v321_v29 = vld [vmem:[%s1107_s2 + $0x18] sm:$0xff] }
  0x36   : > { %v231_v13 = vmin.f32 %v223_v4, 40.0  ;;  %v233_v14 = vmin.f32 %v225_v5, 40.0  ;;  %v230_v15 = vmin.f32 %v222_v6, 40.0  ;;  %v232_v16 = vmin.f32 %v224_v7, 40.0  ;;  %324 = vperm.xlu0 %712, %v318_v17   ;;  %334 = vperm.xlu1 %713, %v320_v21   ;;  %s1120_s15 = smov (!%p203_p7, %s836_s15), 1 }
  0x37   : > { %v235_v18 = vmin.f32 %v227_v9, 40.0  ;;  %v237_v19 = vmin.f32 %v229_v10, 40.0  ;;  %v234_v20 = vmin.f32 %v226_v11, 40.0  ;;  %v236_v27 = vmin.f32 %v228_v12, 40.0  ;;  %s576_s22 = sshll.u32 %s1120_s15, 5 }
  0x38   : > { %v240_v23 = vmul.f32 1.442695, %v231_v13  ;;  %v244_v24 = vmul.f32 1.442695, %v233_v14  ;;  %v238_v25 = vmul.f32 1.442695, %v230_v15  ;;  %s1063_s27 = scalar_lea.vmem %s1108_s3, %s576_s22 }
  0x39   : > { %v242_v26 = vmul.f32 1.442695, %v232_v16  ;;  %v248_v28 = vmul.f32 1.442695, %v235_v18  ;;  %v252_v30 = vmul.f32 1.442695, %v237_v19 }
  0x3a   : > { %716 = vpow2.f32 %v240_v23  ;;  %329 = vperm.xlu0 %712, %v319_v22   ;;  %v246_v31 = vmul.f32 1.442695, %v234_v20  ;;  %339 = vperm.xlu1 %713, %v321_v29   ;;  %v250_v32 = vmul.f32 1.442695, %v236_v27  ;;  %v850_v3 = vmov 0.0  }
  0x3b   : > { %718 = vpow2.f32 %v244_v24  ;;  %214 = vst.msk [vmem:[#allocation2] sm:$0xff] %vm213_vm1, %v850_v3  ;;  %215 = vst.msk [vmem:[#allocation2 + $0x8] sm:$0xff] %vm213_vm1, %v850_v3 }
  0x3c   : > { %720 = vpow2.f32 %v238_v25  ;;  %216 = vst.msk [vmem:[#allocation2 + $0x10] sm:$0xff] %vm213_vm1, %v850_v3  ;;  %217 = vst.msk [vmem:[#allocation2 + $0x18] sm:$0xff] %vm213_vm1, %v850_v3 }
  0x3d   : > { %722 = vpow2.f32 %v242_v26 }
  0x3e   : > { %724 = vpow2.f32 %v248_v28 }
  0x3f   : > { %726 = vpow2.f32 %v252_v30 }
  0x40   : > { %728 = vpow2.f32 %v246_v31 }
  0x41   : > { %730 = vpow2.f32 %v250_v32 }
  0x44   : > { %v717_v33 = vpop.eup %716 }
  0x45   : > { %v719_v34 = vpop.eup %718  ;;  %v255_v35 = vadd.f32 1.0, %v717_v33 }
  0x46   : > { %v721_v36 = vpop.eup %720  ;;  %v257_v37 = vadd.f32 1.0, %v719_v34 }
  0x47   : > { %v723_v38 = vpop.eup %722  ;;  %v263_v39 = vmul.f32 %v255_v35, %v255_v35  ;;  %v254_v40 = vadd.f32 1.0, %v721_v36 }
  0x48   : > { %v725_v41 = vpop.eup %724  ;;  %v265_v42 = vmul.f32 %v257_v37, %v257_v37  ;;  %v256_v43 = vadd.f32 1.0, %v723_v38 }
  0x49   : > { %v727_v44 = vpop.eup %726  ;;  %v271_v45 = vadd.f32 1.0, %v263_v39  ;;  %v262_v46 = vmul.f32 %v254_v40, %v254_v40  ;;  %v259_v47 = vadd.f32 1.0, %v725_v41 }
  0x4a   : > { %v729_v48 = vpop.eup %728  ;;  %v273_v49 = vadd.f32 1.0, %v265_v42  ;;  %v264_v50 = vmul.f32 %v256_v43, %v256_v43  ;;  %v261_v51 = vadd.f32 1.0, %v727_v44  ;;  %v714_v42 = vld [vmem:[%s1106_s1] sm:$0xff]  }
  0x4b   : > { %v731_v52 = vpop.eup %730  ;;  %732 = vrcp.f32 %v271_v45  ;;  %v270_v53 = vadd.f32 1.0, %v262_v46  ;;  %v267_v54 = vmul.f32 %v259_v47, %v259_v47  ;;  %v258_v55 = vadd.f32 1.0, %v729_v48 }
  0x4c   : > { %734 = vrcp.f32 %v273_v49  ;;  %v272_v56 = vadd.f32 1.0, %v264_v50  ;;  %v269_v57 = vmul.f32 %v261_v51, %v261_v51  ;;  %v260_v58 = vadd.f32 1.0, %v731_v52 }
  0x4d   : > { %736 = vrcp.f32 %v270_v53  ;;  %v275_v59 = vadd.f32 1.0, %v267_v54  ;;  %v266_v60 = vmul.f32 %v258_v55, %v258_v55 }
  0x4e   : > { %738 = vrcp.f32 %v272_v56  ;;  %v277_v61 = vadd.f32 1.0, %v269_v57  ;;  %v268_v62 = vmul.f32 %v260_v58, %v260_v58 }
  0x4f   : > { %740 = vrcp.f32 %v275_v59  ;;  %v274_v63 = vadd.f32 1.0, %v266_v60 }
  0x50   : > { %742 = vrcp.f32 %v277_v61  ;;  %v276_v0 = vadd.f32 1.0, %v268_v62 }
  0x51   : > { %744 = vrcp.f32 %v274_v63 }
  0x52   : > { %746 = vrcp.f32 %v276_v0 }
  0x55   : > { %v733_v13 = vpop.eup %732 }
  0x56   : > { %v735_v14 = vpop.eup %734  ;;  %v287_v15 = vmul.f32 2.0, %v733_v13 }
  0x57   : > { %v737_v16 = vpop.eup %736  ;;  %v289_v17 = vmul.f32 2.0, %v735_v14 }
  0x58   : > { %v739_v18 = vpop.eup %738  ;;  %v295_v19 = vsub.f32 1.0, %v287_v15  ;;  %v286_v20 = vmul.f32 2.0, %v737_v16 }
  0x59   : > { %v741_v21 = vpop.eup %740  ;;  %v297_v22 = vsub.f32 1.0, %v289_v17  ;;  %v288_v23 = vmul.f32 2.0, %v739_v18 }
  0x5a   : > { %v743_v24 = vpop.eup %742  ;;  %v303_v25 = vmul.f32 %v295_v19, %v223_v4  ;;  %v294_v26 = vsub.f32 1.0, %v286_v20  ;;  %v291_v27 = vmul.f32 2.0, %v741_v21 }
  0x5b   : > { %v745_v28 = vpop.eup %744  ;;  %v305_v29 = vmul.f32 %v297_v22, %v225_v5  ;;  %v296_v30 = vsub.f32 1.0, %v288_v23  ;;  %v293_v31 = vmul.f32 2.0, %v743_v24 }
  0x5c   : > { %v747_v32 = vpop.eup %746  ;;  %v302_v33 = vmul.f32 %v294_v26, %v222_v6  ;;  %v299_v34 = vsub.f32 1.0, %v291_v27  ;;  %v290_v35 = vmul.f32 2.0, %v745_v28 }
  0x5d   : > { %v311_v36 = vpack.c.bf16 %v305_v29, %v303_v25  ;;  %v304_v37 = vmul.f32 %v296_v30, %v224_v7  ;;  %v301_v38 = vsub.f32 1.0, %v293_v31  ;;  %v292_v4 = vmul.f32 2.0, %v747_v32 }
  0x5e   : > { %v307_v39 = vmul.f32 %v299_v34, %v227_v9  ;;  %v298_v40 = vsub.f32 1.0, %v290_v35 }
  0x5f   : > { %359 = vmatprep.subr.bf16.mxu0 %v311_v36  ;;  %577 = vmatprep.subr.bf16.mxu1 %v311_v36  ;;  %v310_v5 = vpack.c.bf16 %v304_v37, %v302_v33  ;;  %v309_v41 = vmul.f32 %v301_v38, %v229_v10  ;;  %v300_v1 = vsub.f32 1.0, %v292_v4  ;;  %v715_v10 = vld [vmem:[%s1106_s1 + $0x8] sm:$0xff]   ;;  %v436_v36 = vld [vmem:[#allocation2] sm:$0xff] }
  0x60   : > { %v306_v6 = vmul.f32 %v298_v40, %v226_v11  ;;  %v437_v38 = vld [vmem:[#allocation2 + $0x8] sm:$0xff]  ;;  %v438_v40 = vld [vmem:[#allocation2 + $0x10] sm:$0xff] }
  0x61   : > { %360 = vmatpush1.bf16.msra.mxu0 %v310_v5  ;;  %579 = vmatpush1.bf16.msra.mxu1 %v310_v5  ;;  %v313_v2 = vpack.c.bf16 %v309_v41, %v307_v39  ;;  %v308_v7 = vmul.f32 %v300_v1, %v228_v12 }
  0x63   : > { %361 = vmatprep.subr.bf16.mxu0 %v313_v2  ;;  %578 = vmatprep.subr.bf16.mxu1 %v313_v2  ;;  %v312_v9 = vpack.c.bf16 %v308_v7, %v306_v6  ;;  %v439_v6 = vld [vmem:[#allocation2 + $0x18] sm:$0xff] }
  0x65   : > { %362 = vmatpush1.bf16.msra.mxu0 %v312_v9  ;;  %580 = vmatpush1.bf16.msra.mxu1 %v312_v9 }
  0x68   : > { %571 = vmatmul.mubr.msk.bf16.vlgmr.msra.gmra.mrb[0].mxu0 %vm352_vm0, %v714_v42  ;;  %572 = vmatmul.mubr.msk.bf16.vlgmr.msra.gmra.mrb[0].mxu1 %vm352_vm0, %v715_v10 }
  0xb5   : > { %v325_v8 = vpop.permute.xlu0 %324  ;;  %v335_v11 = vpop.permute.xlu1 %334 }
  0xb9   : > { %v330_v12 = vpop.permute.xlu0 %329  ;;  %v340_v43 = vpop.permute.xlu1 %339 }
 0x13b   : > { %v393_v44 = vpop.f32.mrb[0].mxu0  ;;  %v403_v45 = vpop.f32.mrb[0].mxu1 }
 0x13c   : > { %v394_v46 = vadd.f32 %v393_v44, %v325_v8  ;;  %v404_v47 = vadd.f32 %v403_v45, %v335_v11  ;;  %v395_v48 = vpop.f32.mrb[1].mxu0  ;;  %v405_v49 = vpop.f32.mrb[1].mxu1 }
 0x13d   : > { %v396_v50 = vadd.f32 %v395_v48, %v325_v8  ;;  %v406_v51 = vadd.f32 %v405_v49, %v335_v11  ;;  %v397_v52 = vpop.f32.mrb[2].mxu0  ;;  %v407_v53 = vpop.f32.mrb[2].mxu1 }
 0x13e   : > { %v412_v54 = vmax.f32 %v394_v46, 1e-06  ;;  %v416_v55 = vmax.f32 %v404_v47, 1e-06  ;;  %v398_v56 = vadd.f32 %v397_v52, %v330_v12  ;;  %v408_v57 = vadd.f32 %v407_v53, %v340_v43  ;;  %v399_v58 = vpop.f32.mrb[3].mxu0  ;;  %v409_v59 = vpop.f32.mrb[3].mxu1 }
 0x13f   : > { %v413_v60 = vmax.f32 %v396_v50, 1e-06  ;;  %v417_v61 = vmax.f32 %v406_v51, 1e-06  ;;  %v400_v62 = vadd.f32 %v399_v58, %v330_v12  ;;  %v410_v63 = vadd.f32 %v409_v59, %v340_v43 }
 0x140   : > { %v420_v0 = vmul.f32 %v412_v54, %v412_v54  ;;  %v424_v13 = vmul.f32 %v416_v55, %v416_v55  ;;  %v414_v14 = vmax.f32 %v398_v56, 1e-06  ;;  %v418_v15 = vmax.f32 %v408_v57, 1e-06 }
 0x141   : > { %v421_v16 = vmul.f32 %v413_v60, %v413_v60  ;;  %v425_v17 = vmul.f32 %v417_v61, %v417_v61  ;;  %v415_v18 = vmax.f32 %v400_v62, 1e-06  ;;  %v419_v19 = vmax.f32 %v410_v63, 1e-06 }
 0x142   : > { %v428_v20 = vmul.f32 %v420_v0, %v412_v54  ;;  %v432_v21 = vmul.f32 %v424_v13, %v416_v55  ;;  %v422_v22 = vmul.f32 %v414_v14, %v414_v14  ;;  %v426_v23 = vmul.f32 %v418_v15, %v418_v15 }
 0x143   : > { %v429_v24 = vmul.f32 %v421_v16, %v413_v60  ;;  %v433_v25 = vmul.f32 %v425_v17, %v417_v61  ;;  %v423_v26 = vmul.f32 %v415_v18, %v415_v18  ;;  %v427_v27 = vmul.f32 %v419_v19, %v419_v19 }
 0x144   : > { %v430_v28 = vmul.f32 %v422_v22, %v414_v14  ;;  %v434_v29 = vmul.f32 %v426_v23, %v418_v15 }
 0x145   : > { %v431_v30 = vmul.f32 %v423_v26, %v415_v18  ;;  %v435_v31 = vmul.f32 %v427_v27, %v419_v19  ;;  %v440_v32 = vadd.f32 %v429_v24, %v428_v20  ;;  %v446_v33 = vadd.f32 %v433_v25, %v432_v21 }
 0x147   : > { %441 = vadd.xlane.f32.xlu0 %v440_v32  ;;  %v443_v34 = vadd.f32 %v431_v30, %v430_v28  ;;  %v449_v35 = vadd.f32 %v435_v31, %v434_v29 }
 0x149   : > { %444 = vadd.xlane.f32.xlu1 %v443_v34 }
 0x14b   : > { %447 = vadd.xlane.f32.xlu0 %v446_v33 }
 0x14f   : > { %450 = vadd.xlane.f32.xlu0 %v449_v35 }
 0x1d4   : > { %v442_v37 = vpop.xlane.xlu0 %441 }
 0x1d5   : > { %v452_v4 = vadd.f32 %v442_v37, %v436_v36 }
 0x1d6   : > { %v445_v39 = vpop.xlane.xlu1 %444 }
 0x1d7   : > { %457 = vst.msk [vmem:[#allocation2] sm:$0xff] %vm213_vm1, %v452_v4  ;;  %v453_v5 = vadd.f32 %v445_v39, %v437_v38 }
 0x1d8   : > { %v448_v41 = vpop.xlane.xlu0 %447 }
 0x1d9   : > { %458 = vst.msk [vmem:[#allocation2 + $0x8] sm:$0xff] %vm213_vm1, %v453_v5  ;;  %v454_v1 = vadd.f32 %v448_v41, %v438_v40 }
 0x1db   : > { %459 = vst.msk [vmem:[#allocation2 + $0x10] sm:$0xff] %vm213_vm1, %v454_v1 }
 0x1dc   : > { %v451_v2 = vpop.xlane.xlu0 %450 }
 0x1dd   : > { %v455_v7 = vadd.f32 %v451_v2, %v439_v6 }
 0x1de   : > { %v464_v9 = vld [vmem:[#allocation2] sm:$0xff] }
 0x1df   : > { %v468_v42 = vmul.f32 0.00390625, %v464_v9  ;;  %460 = vst.msk [vmem:[#allocation2 + $0x18] sm:$0xff] %vm213_vm1, %v455_v7 }
 0x1e0   : > { %v465_v10 = vld [vmem:[#allocation2 + $0x8] sm:$0xff] }
 0x1e1   : > { %v583_v3 = vand.u32 2147483647, %v468_v42  ;;  %v469_v8 = vmul.f32 0.00390625, %v465_v10  ;;  %v587_v56 = vand.u32 2147483648, %v468_v42  ;;  %vm582_vm4 = vcmp.lt.f32.partialorder %v468_v42, 0.0 }
 0x1e2   : > { %v466_v11 = vld [vmem:[#allocation2 + $0x10] sm:$0xff]  ;;  %vm581_vm5 = vcmp.eq.f32.partialorder %v468_v42, 0.0 }
 0x1e3   : > { %748 = vlog2.f32 %v583_v3  ;;  %v601_v12 = vand.u32 2147483647, %v469_v8  ;;  %v1046_v43 = vmul.f32 0.00390625, %v466_v11  ;;  %vm591_vm2 = vweird.f32 %v583_v3 }
 0x1e4   : > { %v605_v59 = vand.u32 2147483648, %v469_v8  ;;  %vm593_vm3 = vcmp.eq.f32.partialorder %v583_v3, 0.0  ;;  %vm584_vm7 = vcmp.eq.f32.partialorder %v583_v3, inf  ;;  %vm600_vm9 = vcmp.lt.f32.partialorder %v469_v8, 0.0 }
 0x1e5   : > { %750 = vlog2.f32 %v601_v12  ;;  %v1049_v45 = vand.u32 2147483647, %v1046_v43  ;;  %vm609_vm6 = vweird.f32 %v601_v12  ;;  %v623_v13 = vand.u32 2147483648, %v1046_v43 }
 0x1e6   : > { %v467_v44 = vld [vmem:[#allocation2 + $0x18] sm:$0xff]  ;;  %vm611_vm8 = vcmp.eq.f32.partialorder %v601_v12, 0.0  ;;  %vm599_vm10 = vcmp.eq.f32.partialorder %v469_v8, 0.0  ;;  %vm602_vm12 = vcmp.eq.f32.partialorder %v601_v12, inf  ;;  %vm618_vm14 = vcmp.lt.f32.partialorder %v1046_v43, 0.0 }
 0x1e7   : > { %v1051_v46 = vmul.f32 0.00390625, %v467_v44  ;;  %752 = vlog2.f32 %v1049_v45  ;;  %vm627_vm11 = vweird.f32 %v1049_v45  ;;  %vm629_vm13 = vcmp.eq.f32.partialorder %v1049_v45, 0.0 }
 0x1e8   : > { %vm617_vm15 = vcmp.eq.f32.partialorder %v1046_v43, 0.0 }
 0x1e9   : > { %v1055_v47 = vand.u32 2147483647, %v1051_v46  ;;  %v641_v21 = vand.u32 2147483648, %v1051_v46 }
 0x1eb   : > { %754 = vlog2.f32 %v1055_v47  ;;  %vm645_vm0 = vweird.f32 %v1055_v47 }
 0x1ed   : > { %v749_v48 = vpop.eup %748 }
 0x1ee   : > { %v588_v49 = vmul.f32 0.33333334, %v749_v48 }
 0x1ef   : > { %v751_v50 = vpop.eup %750 }
 0x1f0   : > { %756 = vpow2.f32 %v588_v49  ;;  %v606_v51 = vmul.f32 0.33333334, %v751_v50 }
 0x1f1   : > { %v753_v52 = vpop.eup %752 }
 0x1f2   : > { %758 = vpow2.f32 %v606_v51  ;;  %v624_v53 = vmul.f32 0.33333334, %v753_v52 }
 0x1f4   : > { %760 = vpow2.f32 %v624_v53 }
 0x1f5   : > { %v755_v54 = vpop.eup %754 }
 0x1f6   : > { %v642_v55 = vmul.f32 0.33333334, %v755_v54 }
 0x1f8   : > { %762 = vpow2.f32 %v642_v55 }
 0x1fa   : > { %v757_v57 = vpop.eup %756 }
 0x1fb   : > { %v590_v58 = vor.u32 %v757_v57, %v587_v56 }
 0x1fc   : > { %v759_v60 = vpop.eup %758 }
 0x1fd   : > { %v592_v61 = vsel %vm591_vm2, %v468_v42, %v590_v58  ;;  %v608_v63 = vor.u32 %v759_v60, %v605_v59  ;;  %vm620_vm2 = vcmp.eq.f32.partialorder %v1049_v45, inf }
 0x1fe   : > { %v595_v62 = vsel %vm593_vm3, %v587_v56, %v592_v61  ;;  %v761_v14 = vpop.eup %760  ;;  %vm647_vm3 = vcmp.eq.f32.partialorder %v1055_v47, 0.0 }
 0x1ff   : > { %v596_v0 = vsel %vm582_vm4, nan, %v595_v62  ;;  %v610_v16 = vsel %vm609_vm6, %v469_v8, %v608_v63  ;;  %v626_v19 = vor.u32 %v761_v14, %v623_v13  ;;  %vm636_vm4 = vcmp.lt.f32.partialorder %v1051_v46, 0.0 }
 0x200   : > { %v597_v15 = vsel %vm581_vm5, 0.0, %v596_v0  ;;  %v613_v18 = vsel %vm611_vm8, %v605_v59, %v610_v16  ;;  %vm635_vm5 = vcmp.eq.f32.partialorder %v1051_v46, 0.0  ;;  %vm638_vm6 = vcmp.eq.f32.partialorder %v1055_v47, inf }
 0x201   : > { %v598_v17 = vsel %vm584_vm7, inf, %v597_v15  ;;  %v614_v20 = vsel %vm600_vm9, nan, %v613_v18  ;;  %v628_v24 = vsel %vm627_vm11, %v1046_v43, %v626_v19 }
 0x202   : > { %476 = vst.msk [vmem:[%s1063_s27] sm:$0xff] %vm213_vm1, %v598_v17  ;;  %v763_v22 = vpop.eup %762  ;;  %v615_v23 = vsel %vm599_vm10, 0.0, %v614_v20  ;;  %v631_v26 = vsel %vm629_vm13, %v623_v13, %v628_v24 }
 0x203   : > { %v616_v25 = vsel %vm602_vm12, inf, %v615_v23  ;;  %v644_v27 = vor.u32 %v763_v22, %v641_v21  ;;  %v632_v28 = vsel %vm618_vm14, nan, %v631_v26 }
 0x204   : > { %477 = vst.msk [vmem:[%s1063_s27 + $0x8] sm:$0xff] %vm213_vm1, %v616_v25  ;;  %v633_v29 = vsel %vm617_vm15, 0.0, %v632_v28 }
 0x205   : > { %v646_v30 = vsel %vm645_vm0, %v1051_v46, %v644_v27  ;;  %v634_v31 = vsel %vm620_vm2, inf, %v633_v29 }
 0x206   : > { %v649_v32 = vsel %vm647_vm3, %v641_v21, %v646_v30  ;;  %478 = vst.msk [vmem:[%s1063_s27 + $0x10] sm:$0xff] %vm213_vm1, %v634_v31 }
 0x207   : > { %v650_v33 = vsel %vm636_vm4, nan, %v649_v32 }
 0x208   : > { %v651_v34 = vsel %vm635_vm5, 0.0, %v650_v33 }
 0x209   : > { %v652_v35 = vsel %vm638_vm6, inf, %v651_v34 }
 0x20a   : > { %479 = vst.msk [vmem:[%s1063_s27 + $0x18] sm:$0xff] %vm213_vm1, %v652_v35 }
 0x20b PF: > { %s16_s17 = sadd.s32 1, %s844_s17   ;;  %s1112_s12 = smov %s828_s13 }
 0x20c   : > { %p13_p9 = scmp.ge.s32.totalorder %s16_s17, 4   ;;  %s1113_s13 = smov %s832_s14 }
 0x20d   : > { %s1114_s14 = smov %s920_s24  ;;  %s1115_s15 = smov %s840_s16 }
 0x20e   : > { %s1116_s16 = smov %s1118_s19  ;;  %15 = sbr.rel (!%p13_p9) target bundleno = 4 (0x4), region = 80 }
 0x215   :  { %501 = vsyncpa [#allocation4], 1 }
 0x216   :  { %503 = vsyncpa [#allocation4 + $0x1], 1 }

</bundles_post_ra>
